<compile_context>
chip_gen: v7x
topology: tpu7x:2x2x1
jax: 0.10.0
libtpu: 0.0.40
codegen_flags: <defaults>
</compile_context>

<pallas_src>
import functools

import jax
import jax.numpy as jnp
from jax.experimental import pallas as pl
from jax.experimental.pallas import tpu as pltpu

LANES = 128
MAX_TILE_ROWS = 2048  # (2048,128) f32 block = 1 MiB; 2 inputs x 2 buffers = 4 MiB VMEM


def _modulating_factor(d, gamma):
    # |true - sigmoid(pred)| ** gamma with EUP-cheap specializations for the
    # gammas YOLOv5 actually uses; never fall into the exp(g*log(d)) path for
    # the common cases (each extra transcendental is ~33% on v7x's EUP slot).
    if gamma == 1.5:
        return d * jnp.sqrt(d)
    if gamma == 2.0:
        return d * d
    if gamma == 1.0:
        return d
    if gamma == 0.5:
        return jnp.sqrt(d)
    return jnp.where(d > 0.0, jnp.exp(gamma * jnp.log(d)), 0.0)   # generic pow


def _qfocal_elementwise(x, t, gamma, alpha):
    """Elementwise QFocal(BCEWithLogits) loss in f32 (shared by kernel & tail)."""
    x = x.astype(jnp.float32)
    t = t.astype(jnp.float32)
    # Shared transcendental: e = exp(-|x|) feeds the stable BCE log term and
    # the sigmoid (saves one EUP exp per element).
    e = jnp.exp(-jnp.abs(x))
    # BCEWithLogitsLoss(reduction='none'), numerically stable:
    #   max(x, 0) - x*t + log(1 + exp(-|x|))
    bce = jnp.maximum(x, 0.0) - x * t + jnp.log1p(e)
    # sigmoid(x) reusing e:  x>=0 -> 1/(1+e) ;  x<0 -> e/(1+e)
    inv = 1.0 / (1.0 + e)
    pred_prob = jnp.where(x >= 0.0, inv, e * inv)
    alpha_factor = t * alpha + (1.0 - t) * (1.0 - alpha)
    d = jnp.abs(t - pred_prob)
    return bce * alpha_factor * _modulating_factor(d, gamma)


def _qfocal_kernel(pred_ref, true_ref, out_ref, *, gamma, alpha, tile_rows):
    loss = _qfocal_elementwise(pred_ref[...], true_ref[...], gamma, alpha)
    # Per-block partial sum reduced to one (8, 128) vreg tile: grouping rows by
    # 8 follows the native (8,128) tiling, so the reshape is movement-free and
    # the reduction is plain vreg adds (VPU).  The store is fully lane-dense.
    out_ref[0] = loss.reshape(tile_rows // 8, 8, LANES).sum(axis=0)


def qfocal_loss(pred, true, gamma=1.5, alpha=0.25, reduction="mean",
                max_tile_rows=MAX_TILE_ROWS):
    """QFocalLoss(BCEWithLogitsLoss()) forward; scalar ('mean'/'sum')."""
    assert pred.shape == true.shape
    gamma = float(gamma)   # Python float -> specialized (pow-free) branch
    alpha = float(alpha)
    n = pred.size
    itemsize = pred.dtype.itemsize

    p = pred.reshape(-1)   # free bitcast for contiguous inputs
    t = true.reshape(-1)

    # bf16 packs two rows per sublane -> keep tiles a multiple of 16 rows.
    sub = 8 if itemsize >= 4 else 16
    rows_full = n // LANES                                   # complete 128-lane rows
    mtr = max(sub, (int(max_tile_rows) // sub) * sub)
    tile_rows = min(mtr, (rows_full // sub) * sub)
    if tile_rows >= sub and rows_full // tile_rows < 2 and rows_full >= 2 * sub:
        # Split into >= 2 independent blocks so both v7x TensorCores get work.
        tile_rows = ((rows_full // 2) // sub) * sub
    num_blocks = rows_full // tile_rows if tile_rows else 0

    total = jnp.float32(0.0)
    main_elems = 0
    if num_blocks:
        main_rows = num_blocks * tile_rows
        main_elems = main_rows * LANES
        if n % LANES == 0:
            # Free bitcast view; the grid only reads the first main_rows rows,
            # trailing rows are never touched -> zero copy / zero padding work.
            p2d = p.reshape(rows_full, LANES)
            t2d = t.reshape(rows_full, LANES)
        else:
            # Lane-unaligned total size: a copy of the aligned prefix is
            # unavoidable to get a (rows, 128) view.  Only this case pays it;
            # lane-aligned sizes (the common case) are zero-copy.
            p2d = p[:main_elems].reshape(main_rows, LANES)
            t2d = t[:main_elems].reshape(main_rows, LANES)

        kernel = functools.partial(_qfocal_kernel, gamma=gamma, alpha=alpha,
                                   tile_rows=tile_rows)
        partials = pl.pallas_call(
            kernel,
            out_shape=jax.ShapeDtypeStruct((num_blocks, 8, LANES), jnp.float32),
            grid_spec=pltpu.PrefetchScalarGridSpec(
                num_scalar_prefetch=0,
                grid=(num_blocks,),
                in_specs=[
                    pl.BlockSpec((tile_rows, LANES), lambda i: (i, 0)),
                    pl.BlockSpec((tile_rows, LANES), lambda i: (i, 0)),
                ],
                out_specs=pl.BlockSpec((1, 8, LANES), lambda i: (i, 0, 0)),
            ),
            compiler_params=pltpu.CompilerParams(
                # Blocks are independent -> shardable across v7x's two TCs.
                dimension_semantics=("parallel",),
                # Headroom for the larger blocks on v5e's 16 MiB scoped default.
                vmem_limit_bytes=32 * 1024 * 1024,
            ),
            cost_estimate=pl.CostEstimate(
                flops=16 * main_elems,
                transcendentals=3 * main_elems,
                bytes_accessed=2 * main_elems * itemsize
                               + num_blocks * 8 * LANES * 4,
            ),
        )(p2d, t2d)
        total = jnp.sum(partials, dtype=jnp.float32)

    if main_elems < n:
        # < 1 tile of ragged tail (also the whole input when it is < 1 block):
        # tiny, summed with plain XLA and added in -- no padding, no masking.
        total = total + jnp.sum(
            _qfocal_elementwise(p[main_elems:], t[main_elems:], gamma, alpha),
            dtype=jnp.float32)

    if reduction == "mean":
        return total / jnp.float32(n)
    if reduction == "sum":
        return total
    # TODO(synk): reduction == 'none' (full elementwise loss tensor) not implemented.
    raise NotImplementedError(f"reduction={reduction!r}")


def _qfocal_ref(pred, true, gamma=1.5, alpha=0.25, reduction="mean"):
    x = pred.astype(jnp.float32)
    t = true.astype(jnp.float32)
    bce = jnp.maximum(x, 0.0) - x * t + jnp.log1p(jnp.exp(-jnp.abs(x)))
    prob = jax.nn.sigmoid(x)
    af = t * alpha + (1.0 - t) * (1.0 - alpha)
    mf = jnp.abs(t - prob) ** gamma
    loss = bce * af * mf
    return jnp.mean(loss) if reduction == "mean" else jnp.sum(loss)


if __name__ == "__main__":
    key = jax.random.PRNGKey(0)
    k1, k2 = jax.random.split(key)

    # NCHW logits and soft (quality focal) targets in [0, 1].
    shape = (2, 4, 16, 16)                      # 2048 elems: lane-aligned, zero-copy, 2 blocks
    pred = jax.random.normal(k1, shape, dtype=jnp.float32)
    true = jax.random.uniform(k2, shape, dtype=jnp.float32)
    out = jax.block_until_ready(qfocal_loss(pred, true))
    ref = _qfocal_ref(pred, true)
    assert jnp.allclose(out, ref, rtol=1e-5, atol=1e-6), (out, ref)

    # Lane-unaligned size: prefix blocks + ragged jnp tail.
    shape2 = (3, 5, 19, 23)                     # 6555 elems -> not a multiple of 128
    p2 = jax.random.normal(k1, shape2, dtype=jnp.float32)
    t2 = jax.random.uniform(k2, shape2, dtype=jnp.float32)
    out2 = jax.block_until_ready(qfocal_loss(p2, t2, max_tile_rows=16))
    ref2 = _qfocal_ref(p2, t2)
    assert jnp.allclose(out2, ref2, rtol=1e-5, atol=1e-6), (out2, ref2)

    # Different (gamma, alpha), 'sum' reduction, lane-aligned, 3 blocks.
    shape3 = (4, 3, 8, 32)                      # 3072 elems
    p3 = jax.random.normal(k2, shape3, dtype=jnp.float32)
    t3 = jax.random.uniform(k1, shape3, dtype=jnp.float32)
    out3 = jax.block_until_ready(
        qfocal_loss(p3, t3, gamma=2.0, alpha=0.5, reduction="sum"))
    ref3 = _qfocal_ref(p3, t3, gamma=2.0, alpha=0.5, reduction="sum")
    assert jnp.allclose(out3, ref3, rtol=1e-5, atol=1e-3), (out3, ref3)

    print("KERNEL_OK")
</pallas_src>

<mosaic_0001>
module attributes {stable_mosaic.version = 11 : i64} {
  func.func @_qfocal_kernel(%arg0: i32, %arg1: memref<8x128xf32, #tpu.memory_space<vmem>>, %arg2: memref<8x128xf32, #tpu.memory_space<vmem>>, %arg3: memref<1x8x128xf32, #tpu.memory_space<vmem>>) attributes {dimension_semantics = [#tpu.dimension_semantics<parallel>], iteration_bounds = array<i64: 2>, scalar_prefetch = 0 : i64, scratch_operands = 0 : i64, tpu.core_type = #tpu.core_type<tc>, window_params = [{transform_indices = @transform_0, window_bounds = array<i64: 8, 128>}, {transform_indices = @transform_1, window_bounds = array<i64: 8, 128>}, {transform_indices = @transform_2, window_bounds = array<i64: 1, 8, 128>}]} {
    %c0 = arith.constant 0 : index
    %c0_0 = arith.constant 0 : index
    %0 = vector.load %arg1[%c0, %c0_0] : memref<8x128xf32, #tpu.memory_space<vmem>>, vector<8x128xf32>
    %c0_1 = arith.constant 0 : index
    %c0_2 = arith.constant 0 : index
    %1 = vector.load %arg2[%c0_1, %c0_2] : memref<8x128xf32, #tpu.memory_space<vmem>>, vector<8x128xf32>
    %2 = math.absf %0 : vector<8x128xf32>
    %cst = arith.constant 0.000000e+00 : f32
    %3 = vector.broadcast %cst : f32 to vector<8x128xf32>
    %4 = arith.subf %3, %2 : vector<8x128xf32>
    %5 = math.exp %4 : vector<8x128xf32>
    %cst_3 = arith.constant 0.000000e+00 : f32
    %6 = vector.broadcast %cst_3 : f32 to vector<8x128xf32>
    %7 = arith.maximumf %0, %6 : vector<8x128xf32>
    %8 = arith.mulf %0, %1 : vector<8x128xf32>
    %9 = arith.subf %7, %8 : vector<8x128xf32>
    %10 = math.log1p %5 : vector<8x128xf32>
    %11 = arith.addf %9, %10 : vector<8x128xf32>
    %cst_4 = arith.constant 1.000000e+00 : f32
    %12 = vector.broadcast %cst_4 : f32 to vector<8x128xf32>
    %13 = arith.addf %12, %5 : vector<8x128xf32>
    %cst_5 = arith.constant 1.000000e+00 : f32
    %14 = vector.broadcast %cst_5 : f32 to vector<8x128xf32>
    %15 = arith.divf %14, %13 : vector<8x128xf32>
    %cst_6 = arith.constant 0.000000e+00 : f32
    %16 = vector.broadcast %cst_6 : f32 to vector<8x128xf32>
    %17 = arith.cmpf oge, %0, %16 : vector<8x128xf32>
    %18 = arith.mulf %5, %15 : vector<8x128xf32>
    %19 = arith.select %17, %15, %18 : vector<8x128xi1>, vector<8x128xf32>
    %cst_7 = arith.constant 2.500000e-01 : f32
    %20 = vector.broadcast %cst_7 : f32 to vector<8x128xf32>
    %21 = arith.mulf %1, %20 : vector<8x128xf32>
    %cst_8 = arith.constant 1.000000e+00 : f32
    %22 = vector.broadcast %cst_8 : f32 to vector<8x128xf32>
    %23 = arith.subf %22, %1 : vector<8x128xf32>
    %cst_9 = arith.constant 7.500000e-01 : f32
    %24 = vector.broadcast %cst_9 : f32 to vector<8x128xf32>
    %25 = arith.mulf %23, %24 : vector<8x128xf32>
    %26 = arith.addf %21, %25 : vector<8x128xf32>
    %27 = arith.subf %1, %19 : vector<8x128xf32>
    %28 = math.absf %27 : vector<8x128xf32>
    %29 = arith.mulf %11, %26 : vector<8x128xf32>
    %30 = math.sqrt %28 : vector<8x128xf32>
    %31 = arith.mulf %28, %30 : vector<8x128xf32>
    %32 = arith.mulf %29, %31 : vector<8x128xf32>
    %33 = vector.shape_cast %32 : vector<8x128xf32> to vector<1x8x128xf32>
    %cst_10 = arith.constant dense<0.000000e+00> : vector<8x128xf32>
    %34 = vector.multi_reduction <add>, %33, %cst_10 [0] : vector<1x8x128xf32> to vector<8x128xf32>
    %c0_11 = arith.constant 0 : index
    %c0_12 = arith.constant 0 : index
    %c0_13 = arith.constant 0 : index
    %35 = vector.load %arg3[%c0_11, %c0_12, %c0_13] : memref<1x8x128xf32, #tpu.memory_space<vmem>>, vector<1x8x128xf32>
    %36 = vector.shape_cast %35 : vector<1x8x128xf32> to vector<8x128xf32>
    %37 = vector.shape_cast %34 : vector<8x128xf32> to vector<1x8x128xf32>
    tpu.vector_store %arg3[%c0_11, %c0_12, %c0_13], %37 {strides = array<i32>} : memref<1x8x128xf32, #tpu.memory_space<vmem>>, vector<1x8x128xf32>,
    return
  }
  func.func @transform_0(%arg0: i32) -> (i32, i32) {
    %c0_i32 = arith.constant 0 : i32
    %c0_i32_0 = arith.constant 0 : i32
    return %arg0, %c0_i32 : i32, i32
  }
  func.func @transform_1(%arg0: i32) -> (i32, i32) {
    %c0_i32 = arith.constant 0 : i32
    %c0_i32_0 = arith.constant 0 : i32
    return %arg0, %c0_i32 : i32, i32
  }
  func.func @transform_2(%arg0: i32) -> (i32, i32, i32) {
    %c0_i32 = arith.constant 0 : i32
    %c0_i32_0 = arith.constant 0 : i32
    %c0_i32_1 = arith.constant 0 : i32
    return %arg0, %c0_i32, %c0_i32_0 : i32, i32, i32
  }
}

</mosaic_0001>

<bundles_post_ra>
// kernel: tpu_custom_call.1
= control target key start
LH: loop header
LB: loop body
LE: loop exit
PB: predicated region body
PF: predicated region fallthrough
CT: control target
= control target key end

     0   :  { %7 = vsyncpa [#allocation3], 0  ;;  %s784_s0 = inlined_call_operand.hbm [shape: f32[16,128], index: 0, kind: input, shape index: {}]   ;;  %s785_s1 = inlined_call_operand.hbm [shape: f32[16,128], index: 1, kind: input, shape index: {}]   ;;  %s786_s2 = inlined_call_operand.hbm [shape: f32[2,8,128], index: 2, kind: output, shape index: {}]  }
   0x1   :  { %9 = vsyncpa [#allocation3 + $0x1], 0 }
   0x2   :  { %10 = vsyncpa [#allocation6], 0 }
   0x3   :  { %12 = vsyncpa [#allocation6 + $0x1], 0 }
   0x4   :  { %13 = vsyncpa [#allocation4], 0 }
   0x5   :  { %15 = vsyncpa [#allocation4 + $0x1], 0  ;;  %s570_s9 = smov 0   ;;  %s572_s10 = smov 0  }
   0x6   :  { %s574_s11 = smov 0   ;;  %s576_s12 = smov 0  }
   0x7 LB: > { %s591_s13 = sadd.s32 4294967295, %s550_s12   ;;  %s346_s14 = sadd.s32 4294967294, %s550_s12   ;;  %s550_s12 = sphi %s576_s12, %s805_s12   ;;  %s546_s11 = sphi %s574_s11, %s804_s11   ;;  %s542_s10 = sphi %s572_s10, %s803_s10   ;;  %s538_s9 = sphi %s570_s9, %s802_s9  }
   0x8   : > { %s595_s15 = sadd.s32 1, %s550_s12   ;;  %s28_s16 = sadd.s32 1, %s546_s11 }
   0x9   : > { %s25_s17 = ssub.s32 %s550_s12, %s595_s15  ;;  %p35_p0 = scmp.ne.s32.totalorder %s546_s11, %s542_s10 }
   0xa   : > { %p26_p1 = scmp.eq.s32.totalorder %s25_s17, 0  ;;  %p36_p2 = scmp.eq.s32.totalorder %s550_s12, 0 }
   0xb   : > { %p41_p3 = scmp.ne.s32.totalorder %s542_s10, %s538_s9  ;;  %p42_p4 = scmp.eq.s32.totalorder %s591_s13, 0 }
   0xc   : > { %s607_s18 = scalar_select %p26_p1, %s546_s11, %s28_s16  }
   0xd   : > { %p609_p5 = por %p36_p2, %p35_p0  ;;  %p613_p6 = por %p42_p4, %p41_p3 }
   0xe   : > { %p91_p7 = scmp.eq.s32.totalorder %s591_s13, 1  ;;  %p97_p8 = scmp.eq.s32.totalorder %s346_s14, 1 }
   0xf   : > { %s790_s20 = scalar_select %p613_p6, 1, 0 }
  0x10   : > { %p378_p10 = scmp.lt.s32.totalorder %s550_s12, 2  ;;  %p620_p11 = por %p91_p7, %p35_p0 }
  0x11   : > { %p624_p12 = por %p97_p8, %p41_p3  ;;  %s629_s23 = sand.u32 1, %s546_s11  }
  0x12   : > { %s791_s21 = scalar_select %p620_p11, 1, 0 }
  0x13   : > { %s792_s22 = scalar_select %p624_p12, 1, 0 }
  0x14   : > { %s350_s24 = sshll.u32 %s550_s12, 7  ;;  %s349_s25 = sshll.u32 %s629_s23, 3 }
  0x15   : > { %s638_s28 = scalar_lea.hbm %s784_s0, %s350_s24  ;;  %s121_s29 = scalar_lea.vmem [#allocation2], %s349_s25 }
  0x16   : > { %s128_s30 = sshll.u32 %s121_s29, 4  ;;  %p644_p13 = pnand %p378_p10, %p609_p5  ;;  %s648_s30 = int_to_ptr.vmem [resolvable:$true] %s128_s30 }
  0x17   : > { %s118_s4 = scalar_lea.sflag [#allocation3], %s629_s23  ;;  %s420_s5 = scalar_lea.hbm %s638_s28, 128 }
  0x18   : > { %p421_p2 = scmp.ne.s32.totalorder %s638_s28, %s420_s5  ;;  %p422_p3 = pneg %p644_p13 }
  0x19   : > { %s425_s8 = scalar_lea.hbm %s784_s0, 256  ;;  %p426_p5 = scmp.lt.u32.totalorder %s638_s28, %s784_s0 }
  0x1a   : > { %p423_p4 = pnand %p422_p3, %p421_p2  ;;  %p427_p8 = scmp.lt.u32.totalorder %s425_s8, %s420_s5 }
  0x1b   : > { %p429_p9 = scmp.lt.u32.totalorder %s420_s5, %s638_s28 }
  0x1c   : > { %p424_p7 = pneg %p423_p4  ;;  %p428_p10 = por %p427_p8, %p426_p5 }
  0x1e   : > { %p430_p0 = por %p429_p9, %p428_p10 }
  0x20   : > { %p431_p1 = pnand %p430_p0, %p424_p7 }
  0x22   : > { %434 = shalt.err (!%p431_p1)
}
  0x23   : > { %s435_s17 = scalar_lea.vmem %s648_s30, 128  ;;  %s552_s19 = smov [#allocation2]  }
  0x24   : > { %p436_p2 = scmp.ne.s32.totalorder %s648_s30, %s435_s17  ;;  %s440_s26 = sshll.u32 %s552_s19, 4  ;;  %s441_s26 = int_to_ptr.vmem [resolvable:$false] %s440_s26 }
  0x25   : > { %s442_s27 = scalar_lea.vmem %s441_s26, 256  ;;  %p443_p11 = scmp.lt.s32.totalorder %s648_s30, %s441_s26 }
  0x26   : > { %p438_p4 = pnand %p436_p2, %p422_p3  ;;  %p444_p5 = scmp.lt.s32.totalorder %s442_s27, %s435_s17 }
  0x28   : > { %p439_p12 = pneg %p438_p4  ;;  %p445_p8 = por %p444_p5, %p443_p11 }
  0x2a   : > { %p446_p9 = pnand %p445_p8, %p439_p12 }
  0x2c   : > { %449 = shalt.err (!%p446_p9)
}
  0x2d   : > { %370 = dma.hbm_to_vmem [thread:$0]  (!%p644_p13), %s638_s28, 128, %s648_s30, %s118_s4  }
  0x2e   : > { %p794_p0 = scmp.lt.s32.totalorder %s550_s12, 3  ;;  %p795_p1 = scmp.ge.s32.totalorder %s550_s12, 1 }
  0x2f   : > { %s691_s7 = scalar_lea.hbm %s785_s1, %s350_s24  ;;  %s139_s8 = scalar_lea.vmem [#allocation5], %s349_s25 }
  0x30   : > { %p682_p7 = pnand %p795_p1, %p794_p0  ;;  %s146_s14 = sshll.u32 %s139_s8, 4  ;;  %s147_s14 = int_to_ptr.vmem [resolvable:$true] %s146_s14 }
  0x31   : > { %s136_s28 = scalar_lea.sflag [#allocation6], %s629_s23  ;;  %s450_s30 = scalar_lea.hbm %s691_s7, 128 }
  0x32   : > { %s796_s29 = scalar_select %p682_p7, 1, 0 }
  0x33   : > { %p451_p11 = scmp.ne.s32.totalorder %s691_s7, %s450_s30  ;;  %s455_s24 = scalar_lea.hbm %s785_s1, 256 }
  0x34   : > { %p456_p2 = scmp.lt.u32.totalorder %s691_s7, %s785_s1  ;;  %p457_p4 = scmp.lt.u32.totalorder %s455_s24, %s450_s30 }
  0x35   : > { %p453_p12 = pnand %p451_p11, %p422_p3  ;;  %p459_p8 = scmp.lt.u32.totalorder %s450_s30, %s691_s7 }
  0x36   : > { %p458_p5 = por %p457_p4, %p456_p2 }
  0x37   : > { %p454_p10 = pneg %p453_p12 }
  0x38   : > { %p460_p9 = por %p459_p8, %p458_p5 }
  0x3a   : > { %p461_p0 = pnand %p460_p9, %p454_p10 }
  0x3c   : > { %464 = shalt.err (!%p461_p0)
}
  0x3d   : > { %s465_s23 = scalar_lea.vmem %s147_s14, 128  ;;  %s553_s25 = smov [#allocation5]  }
  0x3e   : > { %p466_p1 = scmp.ne.s32.totalorder %s147_s14, %s465_s23  ;;  %s470_s26 = sshll.u32 %s553_s25, 4  ;;  %s471_s26 = int_to_ptr.vmem [resolvable:$false] %s470_s26 }
  0x3f   : > { %s472_s27 = scalar_lea.vmem %s471_s26, 256  ;;  %p473_p6 = scmp.lt.s32.totalorder %s147_s14, %s471_s26 }
  0x40   : > { %p468_p11 = pnand %p466_p1, %p422_p3  ;;  %p474_p7 = scmp.lt.s32.totalorder %s472_s27, %s465_s23 }
  0x42   : > { %p469_p12 = pneg %p468_p11  ;;  %p475_p2 = por %p474_p7, %p473_p6 }
  0x44   : > { %p476_p4 = pnand %p475_p2, %p469_p12 }
  0x46   : > { %479 = shalt.err (!%p476_p4)
}
  0x47   : > { %373 = dma.hbm_to_vmem [thread:$0]  (!%p644_p13), %s691_s7, 128, %s147_s14, %s136_s28  }
  0x48   : > { %p797_p10 = scmp.ne.s32.totalorder %s796_s29, 0 }
  0x49   : > { %s718_s5 = sand.u32 (!%p797_p10), 1, %s542_s10   ;;  %p798_p6 = scmp.ne.s32.totalorder (!%p797_p10), %s790_s20, 0 }
  0x4a   : > { %155 = sbr.rel (%p797_p10) target bundleno = 155 (0x9b), region = 28  ;;  %s721_s6 = sshll.u32 (!%p797_p10), %s718_s5, 3 }
  0x4b   : > { %s158_s8 = scalar_lea.sflag (!%p797_p10), [#allocation3], %s718_s5  ;;  %s161_s30 = scalar_lea.vmem (!%p797_p10), [#allocation2], %s721_s6 }
  0x51   : > { %525 = dma.done.wait (%p798_p6), %s158_s8, 128  }
  0x52   : > { %527 = vsyncadd (%p798_p6), %s158_s8, 4294967168  ;;  %s167_s3 = scalar_lea.sflag [#allocation6], %s718_s5  ;;  %s170_s29 = scalar_lea.vmem [#allocation5], %s721_s6 }
  0x53   : > { %529 = dma.done.wait (%p798_p6), %s167_s3, 128  }
  0x54   : > { %531 = vsyncadd (%p798_p6), %s167_s3, 4294967168  ;;  %v196_v0 = vld [vmem:[%s161_s30] sm:$0xff]  ;;  %v197_v7 = vld [vmem:[%s170_s29] sm:$0xff]  ;;  %s195_s20 = scalar_lea.vmem [#allocation7], %s721_s6  ;;  %s358_s14 = sshll.u32 %s591_s13, 7 }
  0x55   : > { %v198_v1 = vand.u32 2147483647, %v196_v0  ;;  %vm218_vm0 = vcmp.ge.f32.partialorder %v196_v0, 0.0  ;;  %v202_v16 = vmax.f32 %v196_v0, 0.0  ;;  %v203_v17 = vmul.f32 %v197_v7, %v196_v0  ;;  %s253_s7 = sshll.u32 %s195_s20, 4  ;;  %s742_s16 = scalar_lea.hbm %s786_s2, %s358_s14  ;;  %s737_s7 = int_to_ptr.vmem [resolvable:$true] %s253_s7 }
  0x56   : > { %v222_v18 = vsub.f32 1.0, %v197_v7  ;;  %v221_v22 = vmul.f32 0.25, %v197_v7  ;;  %s240_s24 = scalar_lea.sflag [#allocation4], %s718_s5  ;;  %s480_s17 = scalar_lea.vmem %s737_s7, 128 }
  0x57   : > { %v199_v2 = vsub.f32 0.0, %v198_v1  ;;  %v204_v21 = vsub.f32 %v202_v16, %v203_v17  ;;  %p481_p13 = scmp.ne.s32.totalorder %s737_s7, %s480_s17  ;;  %p799_p3 = scmp.ne.s32.totalorder %s791_s21, 0 }
  0x58   : > { %v223_v23 = vmul.f32 0.75, %v222_v18  ;;  %s554_s13 = smov [#allocation7]  }
  0x59   : > { %v200_v3 = vmul.f32 1.442695, %v199_v2  ;;  %p482_p7 = pnand %p481_p13, %p799_p3  ;;  %s484_s19 = sshll.u32 %s554_s13, 4  ;;  %s485_s19 = int_to_ptr.vmem [resolvable:$false] %s484_s19 }
  0x5a   : > { %v224_v26 = vadd.f32 %v223_v23, %v221_v22  ;;  %s486_s23 = scalar_lea.vmem %s485_s19, 256  ;;  %p487_p8 = scmp.lt.s32.totalorder %s737_s7, %s485_s19 }
  0x5b   : > { %412 = vpow2.f32 %v200_v3  ;;  %p483_p5 = pneg %p482_p7  ;;  %p488_p9 = scmp.lt.s32.totalorder %s486_s23, %s480_s17 }
  0x5d   : > { %p489_p0 = por %p488_p9, %p487_p8 }
  0x5f   : > { %p490_p1 = pnand %p489_p0, %p483_p5 }
  0x65   : > { %v413_v4 = vpop.eup %412 }
  0x66   : > { %v205_v5 = vadd.f32 1.0, %v413_v4  ;;  %v208_v9 = vmul.f32 -0.5, %v413_v4  ;;  %v211_v15 = vand.u32 2147483647, %v413_v4 }
  0x68   : > { %414 = vrcp.f32 %v205_v5  ;;  %v209_v12 = vadd.f32 1.0, %v208_v9  ;;  %vm212_vm1 = vcmp.lt.f32.partialorder %v211_v15, 0.0004427343 }
  0x69   : > { %416 = vlog2.f32 %v205_v5 }
  0x6a   : > { %v210_v20 = vmul.f32 %v413_v4, %v209_v12 }
  0x72   : > { %v415_v6 = vpop.eup %414 }
  0x73   : > { %v219_v8 = vmul.f32 %v415_v6, %v413_v4  ;;  %v417_v14 = vpop.eup %416 }
  0x74   : > { %v207_v19 = vmul.f32 0.6931472, %v417_v14 }
  0x75   : > { %v220_v10 = vsel %vm218_vm0, %v415_v6, %v219_v8 }
  0x76   : > { %v225_v11 = vsub.f32 %v197_v7, %v220_v10  ;;  %v213_v24 = vsel %vm212_vm1, %v210_v20, %v207_v19 }
  0x77   : > { %v214_v25 = vadd.f32 %v213_v24, %v204_v21 }
  0x78   : > { %v226_v13 = vand.u32 2147483647, %v225_v11 }
  0x79   : > { %v227_v30 = vmul.f32 %v224_v26, %v214_v25 }
  0x7a   : > { %418 = vrsqrt.f32 %v226_v13  ;;  %vm230_vm2 = vcmp.eq.f32.partialorder %v226_v13, inf  ;;  %v233_v28 = vand.u32 2147483648, %v226_v13  ;;  %vm232_vm3 = vcmp.eq.f32.partialorder %v226_v13, 0.0 }
  0x84   : > { %v419_v27 = vpop.eup %418 }
  0x85   : > { %v229_v29 = vmul.f32 %v419_v27, %v226_v13 }
  0x87   : > { %v231_v31 = vsel %vm230_vm2, %v226_v13, %v229_v29 }
  0x88   : > { %v234_v32 = vsel %vm232_vm3, %v233_v28, %v231_v31 }
  0x89   : > { %v235_v33 = vmul.f32 %v234_v32, %v226_v13 }
  0x8b   : > { %v236_v34 = vmul.f32 %v235_v33, %v227_v30 }
  0x8d   : > { %238 = vst [vmem:[%s195_s20] sm:$0xff] %v236_v34 }
  0x8e   : > { %493 = shalt.err (!%p490_p1)
}
  0x8f   : > { %s494_s25 = scalar_lea.hbm %s742_s16, 128  ;;  %s498_s5 = scalar_lea.hbm %s786_s2, 256 }
  0x90   : > { %p495_p11 = scmp.ne.s32.totalorder %s742_s16, %s494_s25  ;;  %p499_p4 = scmp.lt.u32.totalorder %s742_s16, %s786_s2 }
  0x91   : > { %p500_p10 = scmp.lt.u32.totalorder %s498_s5, %s494_s25  ;;  %p502_p13 = scmp.lt.u32.totalorder %s494_s25, %s742_s16 }
  0x92   : > { %p496_p12 = pnand %p495_p11, %p799_p3 }
  0x93   : > { %p501_p6 = por %p500_p10, %p499_p4 }
  0x94   : > { %p497_p2 = pneg %p496_p12 }
  0x95   : > { %p503_p7 = por %p502_p13, %p501_p6 }
  0x97   : > { %p504_p5 = pnand %p503_p7, %p497_p2 }
  0x99   : > { %507 = shalt.err (!%p504_p5)
}
  0x9a   : > { %365 = dma.vmem_to_hbm [thread:$0]  (%p799_p3), %s737_s7, 128, %s742_s16, %s240_s24  }
  0x9b PF: > { %s265_s30 = sand.u32 1, %s538_s9   ;;  %p800_p8 = scmp.ne.s32.totalorder %s792_s22, 0 }
  0x9c   : > { %p801_p9 = scmp.ge.s32.totalorder %s550_s12, 2  ;;  %s266_s3 = scalar_lea.sflag [#allocation4], %s265_s30 }
  0x9e   : > { %p375_p0 = pnand %p801_p9, %p800_p8 }
  0xa0   : > { %533 = dma.done.wait (!%p375_p0), %s266_s3, 128  }
  0xa1   : > { %535 = vsyncadd (!%p375_p0), %s266_s3, 4294967168  ;;  %p18_p1 = scmp.ge.s32.totalorder %s595_s15, 4   ;;  %s802_s9 = smov %s542_s10 }
  0xa2   : > { %s803_s10 = smov %s546_s11  ;;  %s804_s11 = smov %s607_s18 }
  0xa3   : > { %s805_s12 = smov %s595_s15  ;;  %20 = sbr.rel (!%p18_p1) target bundleno = 7 (0x7), region = 86 }
  0xaa   :  { %271 = vsyncpa [#allocation3], 1 }
  0xab   :  { %273 = vsyncpa [#allocation3 + $0x1], 1 }
  0xac   :  { %274 = vsyncpa [#allocation6], 1 }
  0xad   :  { %276 = vsyncpa [#allocation6 + $0x1], 1 }
  0xae   :  { %277 = vsyncpa [#allocation4], 1 }
  0xaf   :  { %279 = vsyncpa [#allocation4 + $0x1], 1 }

</bundles_post_ra>
